<compile_context>
chip_gen: v5e
topology: v5e:2x2
jax: 0.10.0
libtpu: 0.0.40
codegen_flags: <defaults>
</compile_context>

<pallas_src>
import functools
import math

import jax
import jax.numpy as jnp
from jax.experimental import pallas as pl
from jax.experimental.pallas import tpu as pltpu

_LANES = 128


def _focal_loss_kernel(x_ref, y_ref, alpha_ref, sum_ref, cnt_ref,
                       acc_sum, acc_cnt, *,
                       gamma, ignore_index, total_m, block_m, mask_tail):
    j = pl.program_id(1)

    @pl.when(j == 0)
    def _():
        acc_sum[...] = jnp.zeros_like(acc_sum)
        acc_cnt[...] = jnp.zeros_like(acc_cnt)

    x = x_ref[0]            # (C, bm) logits   (classes on sublanes, rows on lanes)
    y = y_ref[0]            # (1, bm) labels
    a = alpha_ref[...]      # (C, 1) class weights

    # Numerically-stable log-softmax over the class (sublane) axis.
    m = jnp.max(x, axis=0, keepdims=True)                       # (1, bm)  XLU
    z = x - m                                                   # (C, bm)  VPU
    lse = jnp.log(jnp.sum(jnp.exp(z), axis=0, keepdims=True))   # (1, bm)  EUP+XLU

    # Gather z[y] and alpha[y] with a one-hot (vectorized, no scatter); the lse
    # subtraction only happens on the gathered (1, bm) row, never on (C, bm).
    cls = jax.lax.broadcasted_iota(jnp.int32, z.shape, 0)       # (C, bm)
    onehot = (cls == y).astype(jnp.float32)                     # (C, bm)
    z_y = jnp.sum(z * onehot, axis=0, keepdims=True)            # (1, bm)
    alpha_w = jnp.sum(a * onehot, axis=0, keepdims=True)        # (1, bm)

    log_pt = z_y - lse                                          # (1, bm)
    pt = jnp.exp(log_pt)
    ce = -alpha_w * log_pt

    if gamma == 0.0:
        loss = ce
    else:
        base = jnp.maximum(1.0 - pt, 0.0)
        if float(gamma).is_integer():
            focal = base ** int(gamma)                  # lowers to multiplies
        else:
            # general float exponent as exp(g*log(x)); floor avoids log(0)
            focal = jnp.exp(gamma * jnp.log(jnp.maximum(base, 1e-30)))
        loss = focal * ce

    valid = y != ignore_index                                   # (1, bm) bool
    if mask_tail:
        col = j * block_m + jax.lax.broadcasted_iota(jnp.int32, y.shape, 1)
        valid = jnp.logical_and(valid, col < total_m)
    vmask = valid.astype(jnp.float32)                           # (1, bm)

    # Vector accumulators: stay on the VPU slot; single XLU reduce at the end.
    acc_sum[...] += loss * vmask
    acc_cnt[...] += vmask

    @pl.when(j == pl.num_programs(1) - 1)
    def _():
        sum_ref[0] = jnp.sum(acc_sum[...], keepdims=True)
        cnt_ref[0] = jnp.sum(acc_cnt[...], keepdims=True)


def _choose_block_m(m, c):
    # Target ~2 MiB of f32 logits per block (multiple of 128 lanes), clamped.
    cap = ((2 << 20) // (4 * c)) // _LANES * _LANES
    cap = max(_LANES, min(cap, 32 * 1024))
    return m if m <= cap else cap   # full-extent block is always layout-legal


def focal_loss(x, y, alpha=None, gamma: float = 0.0,
               reduction: str = "mean", ignore_index: int = -100):
    if reduction not in ("mean", "sum"):
        # TODO(synk): reduction='none' returns only the un-ignored elements
        # (data-dependent output shape) -- not expressible with static shapes.
        raise ValueError("reduction must be 'mean' or 'sum'")

    x = jnp.asarray(x, jnp.float32)
    y = jnp.asarray(y)

    if x.ndim == 2:
        # TODO(synk): the (N, C) case pays one XLA transpose so the N rows land
        # on the lane axis (dense vregs for small C); acceptable single pass.
        n_rows, c = x.shape
        x3 = x.T[None, :, :]                       # (1, C, N): rows -> lanes
        y3 = y.reshape(1, 1, n_rows).astype(jnp.int32)
        b, m = 1, n_rows
    else:
        b, c = x.shape[0], x.shape[1]
        m = int(math.prod(x.shape[2:]))
        x3 = x.reshape(b, c, m)                    # native layout, no transpose
        y3 = y.reshape(b, 1, m).astype(jnp.int32)

    alpha_arr = (jnp.ones((c, 1), jnp.float32) if alpha is None
                 else jnp.asarray(alpha, jnp.float32).reshape(c, 1))

    bm = _choose_block_m(m, c)
    grid_j = -(-m // bm)
    mask_tail = (m % bm) != 0

    kernel = functools.partial(
        _focal_loss_kernel, gamma=float(gamma), ignore_index=int(ignore_index),
        total_m=m, block_m=bm, mask_tail=mask_tail)

    cost = pl.CostEstimate(
        flops=int(b * m * (10 * c + 16)),
        transcendentals=int(b * m * (c + 2)),
        bytes_accessed=int(x3.size * 4 + y3.size * 4 + alpha_arr.size * 4 + 8 * b),
    )

    sums, counts = pl.pallas_call(
        kernel,
        out_shape=(jax.ShapeDtypeStruct((b, 1, 1), jnp.float32),
                   jax.ShapeDtypeStruct((b, 1, 1), jnp.float32)),
        grid_spec=pltpu.PrefetchScalarGridSpec(
            num_scalar_prefetch=0,
            grid=(b, grid_j),
            in_specs=[
                pl.BlockSpec((1, c, bm), lambda bi, ji: (bi, 0, ji)),
                pl.BlockSpec((1, 1, bm), lambda bi, ji: (bi, 0, ji)),
                pl.BlockSpec((c, 1), lambda bi, ji: (0, 0)),
            ],
            out_specs=(
                pl.BlockSpec((1, 1, 1), lambda bi, ji: (bi, 0, 0)),
                pl.BlockSpec((1, 1, 1), lambda bi, ji: (bi, 0, 0)),
            ),
            scratch_shapes=[pltpu.VMEM((1, bm), jnp.float32),
                            pltpu.VMEM((1, bm), jnp.float32)],
        ),
        compiler_params=pltpu.CompilerParams(
            dimension_semantics=("parallel", "arbitrary"),
        ),
        cost_estimate=cost,
    )(x3, y3, alpha_arr)

    total = jnp.sum(sums)
    count = jnp.sum(counts)
    if reduction == "sum":
        return total
    return jnp.where(count > 0, total / jnp.maximum(count, 1.0), 0.0)


def focal_loss_ref(x, y, alpha=None, gamma=0.0, reduction="mean",
                   ignore_index=-100):
    """Pure-JAX reference mirroring the PyTorch module."""
    c = x.shape[1]
    if x.ndim > 2:
        xm = jnp.moveaxis(x, 1, -1).reshape(-1, c)
        ym = y.reshape(-1)
    else:
        xm, ym = x, y.reshape(-1)
    valid = ym != ignore_index
    y_safe = jnp.where(valid, ym, 0).astype(jnp.int32)
    log_p = jax.nn.log_softmax(xm.astype(jnp.float32), axis=-1)
    log_pt = jnp.take_along_axis(log_p, y_safe[:, None], axis=-1)[:, 0]
    a_w = (jnp.ones_like(log_pt) if alpha is None
           else jnp.asarray(alpha, jnp.float32)[y_safe])
    ce = -a_w * log_pt
    pt = jnp.exp(log_pt)
    focal = jnp.power(1.0 - pt, gamma) if gamma != 0.0 else 1.0
    loss = focal * ce * valid.astype(jnp.float32)
    total, count = jnp.sum(loss), jnp.sum(valid)
    if reduction == "sum":
        return total
    return jnp.where(count > 0, total / jnp.maximum(count, 1), 0.0)


if __name__ == "__main__":
    key = jax.random.PRNGKey(0)
    kx, ky, km = jax.random.split(key, 3)
    B, C, H, W = 2, 4, 16, 16

    x = jax.random.normal(kx, (B, C, H, W), dtype=jnp.float32)
    y = jax.random.randint(ky, (B, H, W), 0, C, dtype=jnp.int32)
    # sprinkle some ignored labels to exercise ignore_index masking
    y = jnp.where(jax.random.uniform(km, (B, H, W)) < 0.1, -100, y)

    # full path: per-class alpha weights + gamma modulation
    alpha = jnp.array([0.25, 0.5, 0.75, 1.0], dtype=jnp.float32)
    loss = focal_loss(x, y, alpha=alpha, gamma=2.0)
    jax.block_until_ready(loss)
    ref = focal_loss_ref(x, y, alpha=alpha, gamma=2.0)
    assert jnp.allclose(loss, ref, rtol=1e-4, atol=1e-6), (loss, ref)

    # defaults (alpha=None, gamma=0): plain mean cross-entropy over un-ignored
    loss0 = focal_loss(x, y)
    jax.block_until_ready(loss0)
    ref0 = focal_loss_ref(x, y)
    assert jnp.allclose(loss0, ref0, rtol=1e-4, atol=1e-6), (loss0, ref0)

    # 2-D path + 'sum' reduction
    x2 = jax.random.normal(kx, (64, C), dtype=jnp.float32)
    y2 = jax.random.randint(ky, (64,), 0, C, dtype=jnp.int32)
    loss2 = focal_loss(x2, y2, alpha=alpha, gamma=1.5, reduction="sum")
    jax.block_until_ready(loss2)
    ref2 = focal_loss_ref(x2, y2, alpha=alpha, gamma=1.5, reduction="sum")
    assert jnp.allclose(loss2, ref2, rtol=1e-4, atol=1e-5), (loss2, ref2)

    print("KERNEL_OK")
</pallas_src>

<mosaic_0001>
module attributes {stable_mosaic.version = 11 : i64} {
  func.func @_focal_loss_kernel(%arg0: i32, %arg1: i32, %arg2: memref<1x4x256xf32, #tpu.memory_space<vmem>>, %arg3: memref<1x1x256xi32, #tpu.memory_space<vmem>>, %arg4: memref<4x1xf32, #tpu.memory_space<vmem>>, %arg5: memref<1x1x1xf32, #tpu.memory_space<vmem>>, %arg6: memref<1x1x1xf32, #tpu.memory_space<vmem>>, %arg7: memref<1x256xf32, #tpu.memory_space<vmem>>, %arg8: memref<1x256xf32, #tpu.memory_space<vmem>>) attributes {dimension_semantics = [#tpu.dimension_semantics<parallel>, #tpu.dimension_semantics<arbitrary>], iteration_bounds = array<i64: 2, 1>, scalar_prefetch = 0 : i64, scratch_operands = 2 : i64, tpu.core_type = #tpu.core_type<tc>, window_params = [{transform_indices = @transform_0, window_bounds = array<i64: 1, 4, 256>}, {transform_indices = @transform_1, window_bounds = array<i64: 1, 1, 256>}, {pipeline_mode = #tpu.pipeline_mode<synchronous>, transform_indices = @transform_2, window_bounds = array<i64: 4, 1>}, {transform_indices = @transform_3, window_bounds = array<i64: 1, 1, 1>}, {transform_indices = @transform_4, window_bounds = array<i64: 1, 1, 1>}]} {
    %c0_i32 = arith.constant 0 : i32
    %0 = arith.cmpi eq, %arg1, %c0_i32 : i32
    %1 = arith.extui %0 : i1 to i32
    %c0_i32_0 = arith.constant 0 : i32
    %2 = arith.cmpi ne, %1, %c0_i32_0 : i32
    scf.if %2 {
      %cst_24 = arith.constant 0.000000e+00 : f32
      %53 = vector.broadcast %cst_24 : f32 to vector<1x256xf32>
      %c0_25 = arith.constant 0 : index
      %c0_26 = arith.constant 0 : index
      %54 = vector.load %arg7[%c0_25, %c0_26] : memref<1x256xf32, #tpu.memory_space<vmem>>, vector<1x256xf32>
      tpu.vector_store %arg7[%c0_25, %c0_26], %53 {strides = array<i32>} : memref<1x256xf32, #tpu.memory_space<vmem>>, vector<1x256xf32>,
      %cst_27 = arith.constant 0.000000e+00 : f32
      %55 = vector.broadcast %cst_27 : f32 to vector<1x256xf32>
      %c0_28 = arith.constant 0 : index
      %c0_29 = arith.constant 0 : index
      %56 = vector.load %arg8[%c0_28, %c0_29] : memref<1x256xf32, #tpu.memory_space<vmem>>, vector<1x256xf32>
      tpu.vector_store %arg8[%c0_28, %c0_29], %55 {strides = array<i32>} : memref<1x256xf32, #tpu.memory_space<vmem>>, vector<1x256xf32>,
    } else {
    }
    %c0 = arith.constant 0 : index
    %c0_1 = arith.constant 0 : index
    %c0_2 = arith.constant 0 : index
    %3 = vector.load %arg2[%c0, %c0_1, %c0_2] : memref<1x4x256xf32, #tpu.memory_space<vmem>>, vector<1x4x256xf32>
    %4 = vector.shape_cast %3 : vector<1x4x256xf32> to vector<4x256xf32>
    %c0_3 = arith.constant 0 : index
    %c0_4 = arith.constant 0 : index
    %c0_5 = arith.constant 0 : index
    %5 = vector.load %arg3[%c0_3, %c0_4, %c0_5] : memref<1x1x256xi32, #tpu.memory_space<vmem>>, vector<1x1x256xi32>
    %6 = vector.shape_cast %5 : vector<1x1x256xi32> to vector<1x256xi32>
    %c0_6 = arith.constant 0 : index
    %c0_7 = arith.constant 0 : index
    %7 = vector.load %arg4[%c0_6, %c0_7] : memref<4x1xf32, #tpu.memory_space<vmem>>, vector<4x1xf32>
    %cst = arith.constant dense<0xFF800000> : vector<256xf32>
    %8 = vector.multi_reduction <maximumf>, %4, %cst [0] : vector<4x256xf32> to vector<256xf32>
    %9 = vector.shape_cast %8 : vector<256xf32> to vector<1x256xf32>
    %10 = vector.broadcast %9 : vector<1x256xf32> to vector<4x256xf32>
    %11 = arith.subf %4, %10 : vector<4x256xf32>
    %12 = math.exp %11 : vector<4x256xf32>
    %cst_8 = arith.constant dense<0.000000e+00> : vector<256xf32>
    %13 = vector.multi_reduction <add>, %12, %cst_8 [0] : vector<4x256xf32> to vector<256xf32>
    %14 = vector.shape_cast %13 : vector<256xf32> to vector<1x256xf32>
    %15 = math.log %14 : vector<1x256xf32>
    %16 = tpu.iota {dimensions = array<i32: 0>} : vector<4x256xi32>
    %17 = vector.broadcast %6 : vector<1x256xi32> to vector<4x256xi32>
    %18 = arith.cmpi eq, %16, %17 : vector<4x256xi32>
    %19 = arith.extui %18 : vector<4x256xi1> to vector<4x256xi32>
    %20 = arith.sitofp %19 : vector<4x256xi32> to vector<4x256xf32>
    %21 = arith.mulf %11, %20 : vector<4x256xf32>
    %cst_9 = arith.constant dense<0.000000e+00> : vector<256xf32>
    %22 = vector.multi_reduction <add>, %21, %cst_9 [0] : vector<4x256xf32> to vector<256xf32>
    %23 = vector.shape_cast %22 : vector<256xf32> to vector<1x256xf32>
    %24 = vector.broadcast %7 : vector<4x1xf32> to vector<4x256xf32>
    %25 = arith.mulf %24, %20 : vector<4x256xf32>
    %cst_10 = arith.constant dense<0.000000e+00> : vector<256xf32>
    %26 = vector.multi_reduction <add>, %25, %cst_10 [0] : vector<4x256xf32> to vector<256xf32>
    %27 = vector.shape_cast %26 : vector<256xf32> to vector<1x256xf32>
    %28 = arith.subf %23, %15 : vector<1x256xf32>
    %29 = math.exp %28 : vector<1x256xf32>
    %cst_11 = arith.constant 0.000000e+00 : f32
    %30 = vector.broadcast %cst_11 : f32 to vector<1x256xf32>
    %31 = arith.subf %30, %27 : vector<1x256xf32>
    %32 = arith.mulf %31, %28 : vector<1x256xf32>
    %cst_12 = arith.constant 1.000000e+00 : f32
    %33 = vector.broadcast %cst_12 : f32 to vector<1x256xf32>
    %34 = arith.subf %33, %29 : vector<1x256xf32>
    %cst_13 = arith.constant 0.000000e+00 : f32
    %35 = vector.broadcast %cst_13 : f32 to vector<1x256xf32>
    %36 = arith.maximumf %34, %35 : vector<1x256xf32>
    %37 = arith.mulf %36, %36 : vector<1x256xf32>
    %38 = arith.mulf %37, %32 : vector<1x256xf32>
    %c-100_i32 = arith.constant -100 : i32
    %39 = vector.broadcast %c-100_i32 : i32 to vector<1x256xi32>
    %40 = arith.cmpi ne, %6, %39 : vector<1x256xi32>
    %41 = arith.extui %40 : vector<1x256xi1> to vector<1x256xi32>
    %42 = arith.sitofp %41 : vector<1x256xi32> to vector<1x256xf32>
    %c0_14 = arith.constant 0 : index
    %c0_15 = arith.constant 0 : index
    %43 = vector.load %arg7[%c0_14, %c0_15] : memref<1x256xf32, #tpu.memory_space<vmem>>, vector<1x256xf32>
    %44 = arith.mulf %38, %42 : vector<1x256xf32>
    %45 = arith.addf %43, %44 : vector<1x256xf32>
    %c0_16 = arith.constant 0 : index
    %c0_17 = arith.constant 0 : index
    %46 = vector.load %arg7[%c0_16, %c0_17] : memref<1x256xf32, #tpu.memory_space<vmem>>, vector<1x256xf32>
    tpu.vector_store %arg7[%c0_16, %c0_17], %45 {strides = array<i32>} : memref<1x256xf32, #tpu.memory_space<vmem>>, vector<1x256xf32>,
    %c0_18 = arith.constant 0 : index
    %c0_19 = arith.constant 0 : index
    %47 = vector.load %arg8[%c0_18, %c0_19] : memref<1x256xf32, #tpu.memory_space<vmem>>, vector<1x256xf32>
    %48 = arith.addf %47, %42 : vector<1x256xf32>
    %c0_20 = arith.constant 0 : index
    %c0_21 = arith.constant 0 : index
    %49 = vector.load %arg8[%c0_20, %c0_21] : memref<1x256xf32, #tpu.memory_space<vmem>>, vector<1x256xf32>
    tpu.vector_store %arg8[%c0_20, %c0_21], %48 {strides = array<i32>} : memref<1x256xf32, #tpu.memory_space<vmem>>, vector<1x256xf32>,
    %c0_i32_22 = arith.constant 0 : i32
    %50 = arith.cmpi eq, %arg1, %c0_i32_22 : i32
    %51 = arith.extui %50 : i1 to i32
    %c0_i32_23 = arith.constant 0 : i32
    %52 = arith.cmpi ne, %51, %c0_i32_23 : i32
    scf.if %52 {
      %c0_24 = arith.constant 0 : index
      %c0_25 = arith.constant 0 : index
      %53 = vector.load %arg7[%c0_24, %c0_25] : memref<1x256xf32, #tpu.memory_space<vmem>>, vector<1x256xf32>
      %54 = vector.shape_cast %53 : vector<1x256xf32> to vector<1x1x256xf32>
      %cst_26 = arith.constant dense<0.000000e+00> : vector<1xf32>
      %55 = vector.multi_reduction <add>, %54, %cst_26 [1, 2] : vector<1x1x256xf32> to vector<1xf32>
      %56 = vector.shape_cast %55 : vector<1xf32> to vector<1x1x1xf32>
      %57 = vector.extract %56[0, 0, 0] : f32 from vector<1x1x1xf32>
      %58 = vector.broadcast %57 : f32 to vector<1x1xf32>
      %c0_27 = arith.constant 0 : index
      %c0_28 = arith.constant 0 : index
      %c0_29 = arith.constant 0 : index
      %59 = vector.load %arg5[%c0_27, %c0_28, %c0_29] : memref<1x1x1xf32, #tpu.memory_space<vmem>>, vector<1x1x1xf32>
      %60 = vector.shape_cast %59 : vector<1x1x1xf32> to vector<1x1xf32>
      %61 = vector.shape_cast %58 : vector<1x1xf32> to vector<1x1x1xf32>
      tpu.vector_store %arg5[%c0_27, %c0_28, %c0_29], %61 {strides = array<i32>} : memref<1x1x1xf32, #tpu.memory_space<vmem>>, vector<1x1x1xf32>,
      %c0_30 = arith.constant 0 : index
      %c0_31 = arith.constant 0 : index
      %62 = vector.load %arg8[%c0_30, %c0_31] : memref<1x256xf32, #tpu.memory_space<vmem>>, vector<1x256xf32>
      %63 = vector.shape_cast %62 : vector<1x256xf32> to vector<1x1x256xf32>
      %cst_32 = arith.constant dense<0.000000e+00> : vector<1xf32>
      %64 = vector.multi_reduction <add>, %63, %cst_32 [1, 2] : vector<1x1x256xf32> to vector<1xf32>
      %65 = vector.shape_cast %64 : vector<1xf32> to vector<1x1x1xf32>
      %66 = vector.extract %65[0, 0, 0] : f32 from vector<1x1x1xf32>
      %67 = vector.broadcast %66 : f32 to vector<1x1xf32>
      %c0_33 = arith.constant 0 : index
      %c0_34 = arith.constant 0 : index
      %c0_35 = arith.constant 0 : index
      %68 = vector.load %arg6[%c0_33, %c0_34, %c0_35] : memref<1x1x1xf32, #tpu.memory_space<vmem>>, vector<1x1x1xf32>
      %69 = vector.shape_cast %68 : vector<1x1x1xf32> to vector<1x1xf32>
      %70 = vector.shape_cast %67 : vector<1x1xf32> to vector<1x1x1xf32>
      tpu.vector_store %arg6[%c0_33, %c0_34, %c0_35], %70 {strides = array<i32>} : memref<1x1x1xf32, #tpu.memory_space<vmem>>, vector<1x1x1xf32>,
    } else {
    }
    return
  }
  func.func @transform_0(%arg0: i32, %arg1: i32) -> (i32, i32, i32) {
    %c0_i32 = arith.constant 0 : i32
    %c0_i32_0 = arith.constant 0 : i32
    return %arg0, %c0_i32, %arg1 : i32, i32, i32
  }
  func.func @transform_1(%arg0: i32, %arg1: i32) -> (i32, i32, i32) {
    %c0_i32 = arith.constant 0 : i32
    %c0_i32_0 = arith.constant 0 : i32
    return %arg0, %c0_i32, %arg1 : i32, i32, i32
  }
  func.func @transform_2(%arg0: i32, %arg1: i32) -> (i32, i32) {
    %c0_i32 = arith.constant 0 : i32
    %c0_i32_0 = arith.constant 0 : i32
    %c0_i32_1 = arith.constant 0 : i32
    return %c0_i32, %c0_i32_0 : i32, i32
  }
  func.func @transform_3(%arg0: i32, %arg1: i32) -> (i32, i32, i32) {
    %c0_i32 = arith.constant 0 : i32
    %c0_i32_0 = arith.constant 0 : i32
    %c0_i32_1 = arith.constant 0 : i32
    return %arg0, %c0_i32, %c0_i32_0 : i32, i32, i32
  }
  func.func @transform_4(%arg0: i32, %arg1: i32) -> (i32, i32, i32) {
    %c0_i32 = arith.constant 0 : i32
    %c0_i32_0 = arith.constant 0 : i32
    %c0_i32_1 = arith.constant 0 : i32
    return %arg0, %c0_i32, %c0_i32_0 : i32, i32, i32
  }
}

</mosaic_0001>

<bundles_post_ra>
// kernel: tpu_custom_call.1
= control target key start
LH: loop header
LB: loop body
LE: loop exit
PB: predicated region body
PF: predicated region fallthrough
CT: control target
= control target key end

     0   :  { %10 = vsyncpa [#allocation5], 0  ;;  %s925_s0 = inlined_call_operand.hbm [shape: f32[2,4,256], index: 0, kind: input, shape index: {}]   ;;  %s926_s1 = inlined_call_operand.vmem [shape: s32[2,1,256], index: 1, kind: input, shape index: {}]   ;;  %s927_s2 = inlined_call_operand.vmem [shape: f32[4,1], index: 2, kind: input, shape index: {}]   ;;  %s928_s3 = inlined_call_operand.vmem [shape: f32[2,1,1], index: 3, kind: output, shape index: {0}]   ;;  %s929_s4 = inlined_call_operand.vmem [shape: f32[2,1,1], index: 4, kind: output, shape index: {1}]  }
   0x1   :  { %12 = vsyncpa [#allocation5 + $0x1], 0  ;;  %s791_s15 = smov 0   ;;  %s793_s16 = smov 0  }
   0x2   :  { %s795_s17 = smov 0   ;;  %s797_s18 = smov 0  }
   0x3   :  { %s799_s19 = smov 0   ;;  %s801_s20 = smov 0  }
   0x4 LB: > { %s594_s21 = sadd.s32 4294967295, %s762_s20   ;;  %s30_s22 = sadd.s32 1, %s758_s19  ;;  %s762_s20 = sphi %s801_s20, %s18_s20   ;;  %s758_s19 = sphi %s799_s19, %s938_s19   ;;  %s754_s18 = sphi %s797_s18, %s937_s18   ;;  %s750_s17 = sphi %s795_s17, %s936_s17   ;;  %s746_s16 = sphi %s793_s16, %s935_s16   ;;  %s742_s15 = sphi %s791_s15, %s934_s15  }
   0x5   : > { %p32_p0 = scmp.ge.s32.totalorder %s30_s22, 2  ;;  %s39_s23 = sadd.s32 1, %s750_s17 }
   0x6   : > { %p46_p1 = scmp.ne.s32.totalorder %s750_s17, %s746_s16  ;;  %p47_p2 = scmp.eq.s32.totalorder %s762_s20, 0 }
   0x7   : > { %s940_s22 = smov (%p32_p0, %s30_s22), 0  ;;  %p52_p4 = scmp.ne.s32.totalorder %s746_s16, %s742_s15 }
   0x8   : > { %p827_p3 = por %p47_p2, %p46_p1  ;;  %s34_s25 = ssub.s32 %s758_s19, %s940_s22 }
   0x9   : > { %p53_p5 = scmp.eq.s32.totalorder %s594_s21, 0  ;;  %p37_p6 = scmp.eq.s32.totalorder %s34_s25, 0 }
   0xa   : > { %p620_p8 = scmp.lt.s32.totalorder %s762_s20, 2  ;;  %s180_s28 = sand.u32 1, %s750_s17  }
   0xb   : > { %p834_p7 = por %p53_p5, %p52_p4  ;;  %s609_s29 = sshll.u32 %s758_s19, 3 }
   0xc   : > { %s840_s27 = scalar_select %p37_p6, %s750_s17, %s39_s23  }
   0xd   : > { %s598_s30 = sshll.u32 %s180_s28, 3  ;;  %s191_s7 = scalar_lea.hbm %s925_s0, %s609_s29 }
   0xe   : > { %s193_s8 = sshll.u32 %s191_s7, 4  ;;  %s184_s9 = scalar_lea.vmem [#allocation4], %s598_s30  ;;  %s194_s8 = int_to_ptr.hbm [resolvable:$true] %s193_s8 }
   0xf   : > { %s195_s10 = sshll.u32 %s184_s9, 4  ;;  %p617_p9 = pnand %p620_p8, %p827_p3  ;;  %s196_s10 = int_to_ptr.vmem [resolvable:$true] %s195_s10 }
  0x10   : > { %p601_p10 = scmp.ge.s32.totalorder %s762_s20, 1  ;;  %p212_p11 = scmp.lt.s32.totalorder %s762_s20, 3 }
  0x11   : > { %s181_s11 = scalar_lea.sflag [#allocation5], %s180_s28 }
  0x12   : > { %619 = dma.hbm_to_vmem [thread:$0]  (!%p617_p9), %s194_s8, 128, %s196_s10, %s181_s11  }
  0x13   : > { %p213_p12 = pnand %p601_p10, %p212_p11 }
  0x14   : > { %s218_s12 = sand.u32 (!%p213_p12), 1, %s746_s16  }
  0x15   : > { %216 = sbr.rel (%p213_p12) target bundleno = 366 (0x16e), region = 32  ;;  %s602_s13 = sshll.u32 (!%p213_p12), %s218_s12, 3 }
  0x16   : > { %s219_s14 = scalar_lea.sflag (!%p213_p12), [#allocation5], %s218_s12  ;;  %s222_s15 = scalar_lea.vmem (!%p213_p12), [#allocation4], %s602_s13 }
  0x1a   : > { %737 = dma.done.wait (%p834_p7), %s219_s14, 128  }
  0x1b   : > { %739 = vsyncadd (%p834_p7), %s219_s14, 4294967168  ;;  %v277_v0 = vlaneseq  ;;  %v764_v1 = vmov 0   ;;  %v765_v3 = vmov 0.0   ;;  %v285_v4 = vld [vmem:[%s927_s2] sm:$0xf]  ;;  %v283_v5 = vld [vmem:[%s222_s15] sm:$0xff] }
  0x1c   : > { %671 = vset.pattern.permute.xlu0 %v764_v1  ;;  %287 = vst [vmem:[#allocation1] ss:$2 sm:$0xff] %v283_v5  ;;  %vm292_vm1 = vcmask 1043456   ;;  %p259_p13 = scmp.lt.s32.totalorder %s754_s18, 1  ;;  %vm428_vm5 = vcmask 1040384   ;;  %vm462_vm6 = vcmask 0  }
  0x1d   : > { %vm856_vm0 = vcmp.lt.s32.totalorder %v277_v0, 256  ;;  %377 = vperm.xlu0 %671, %v285_v4   ;;  %v340_v26 = vshrl.u32 %v277_v0, 7 }
  0x1e   : > { %281 = vst.msk [vmem:[#allocation2] sm:$0x3] %vm856_vm0, %v765_v3  ;;  %s942_s18 = smov (!%p259_p13, %s754_s18), 1 }
  0x1f   : > { %282 = vst.msk [vmem:[#allocation3] sm:$0x3] %vm856_vm0, %v765_v3  ;;  %s603_s24 = sshll.u32 %s942_s18, 1  ;;  %s269_s5 = scalar_lea.vmem %s928_s3, %s942_s18 }
  0x20   : > { %s265_s28 = scalar_lea.vmem %s926_s1, %s603_s24  ;;  %s272_s9 = scalar_lea.vmem %s929_s4, %s942_s18 }
  0x21   : > { %v284_v28 = vld [vmem:[%s265_s28] sm:$0x3] }
  0x22   : > { %v342_v29 = vperm.slane %v284_v28, 1  ;;  %v341_v30 = vperm.slane %v284_v28, 0  ;;  %vm414_vm4 = vcmp.ne.s32.totalorder %v284_v28, 4294967196 }
  0x23   : > { %v289_v6 = vld.sshfl [vmem:[#allocation1 + $0x8] sm:$0xff pattern:$0x75316420]  ;;  %v288_v8 = vld.sshfl [vmem:[#allocation1] sm:$0xff pattern:$0x75316420] }
  0x24   : > { %v300_v7 = vsel %vm292_vm1, %v289_v6, -inf  ;;  %v293_v10 = vsel %vm292_vm1, %v288_v8, -inf  ;;  %vm344_vm2 = vcmp.eq.s32.totalorder %v340_v26, %v342_v29  ;;  %vm343_vm3 = vcmp.eq.s32.totalorder %v340_v26, %v341_v30 }
  0x25   : > { %v301_v9 = vrot.slane %v300_v7, 4  ;;  %v294_v11 = vrot.slane %v293_v10, 4  ;;  %v605_v31 = vsel %vm344_vm2, 1.0, %v765_v3  ;;  %v604_v33 = vsel %vm343_vm3, 1.0, %v765_v3 }
  0x26   : > { %v351_v32 = vrot.slane %v605_v31, 4 }
  0x27   : > { %v302_v12 = vmax.f32 %v300_v7, %v301_v9  ;;  %v295_v13 = vmax.f32 %v293_v10, %v294_v11  ;;  %v606_v10 = vsel %vm414_vm4, 1.0, %v765_v3  ;;  %v437_v11 = vld [vmem:[#allocation3] sm:$0x3] }
  0x28   : > { %v352_v34 = vsel %vm292_vm1, %v604_v33, %v351_v32 }
  0x29   : > { %v303_v14 = vrot.slane %v302_v12, 2  ;;  %v296_v15 = vrot.slane %v295_v13, 2 }
  0x2b   : > { %v304_v16 = vmax.f32 %v302_v12, %v303_v14  ;;  %v297_v17 = vmax.f32 %v295_v13, %v296_v15  ;;  %v438_v12 = vadd.f32 %v606_v10, %v437_v11 }
  0x2d   : > { %v305_v18 = vrot.slane %v304_v16, 1  ;;  %v298_v19 = vrot.slane %v297_v17, 1  ;;  %439 = vst.msk [vmem:[#allocation3] sm:$0x3] %vm856_vm0, %v438_v12 }
  0x2f   : > { %v306_v20 = vmax.f32 %v304_v16, %v305_v18  ;;  %v299_v21 = vmax.f32 %v297_v17, %v298_v19 }
  0x31   : > { %v309_v22 = vrot.slane %v306_v20, 4 }
  0x33   : > { %v310_v23 = vsel %vm292_vm1, %v299_v21, %v309_v22 }
  0x34   : > { %v312_v24 = vsub.f32 %v283_v5, %v310_v23  ;;  %v464_v17 = vld [vmem:[#allocation3] sm:$0x3] }
  0x35   : > { %v466_v18 = vperm.slane %v464_v17, 0  ;;  %v467_v19 = vperm.slane %v464_v17, 1 }
  0x36   : > { %v313_v25 = vmul.f32 1.442695, %v312_v24  ;;  %v354_v37 = vmul.f32 %v352_v34, %v312_v24 }
  0x37   : > { %v470_v3 = vsel %vm428_vm5, %v466_v18, 0.0  ;;  %v471_v23 = vsel %vm428_vm5, %v467_v19, 0.0 }
  0x38   : > { %672 = vpow2.f32 %v313_v25  ;;  %v472_v24 = vadd.f32 %v471_v23, %v470_v3 }
  0x3a   : > { %473 = vadd.xlane.f32.xlu1 %v472_v24 }
  0x3e   : > { %v673_v27 = vpop.eup %672 }
  0x3f   : > { %316 = vst [vmem:[#allocation1] ss:$2 sm:$0xff] %v673_v27 }
  0x46   : > { %v317_v35 = vld.sshfl [vmem:[#allocation1] sm:$0xff pattern:$0x75316420]  ;;  %v318_v36 = vld.sshfl [vmem:[#allocation1 + $0x8] sm:$0xff pattern:$0x75316420] }
  0x47   : > { %v321_v38 = vsel %vm292_vm1, %v317_v35, 0.0  ;;  %356 = vst [vmem:[#allocation1] ss:$2 sm:$0xff] %v354_v37  ;;  %v328_v39 = vsel %vm292_vm1, %v318_v36, 0.0 }
  0x48   : > { %v322_v40 = vrot.slane %v321_v38, 4  ;;  %v329_v41 = vrot.slane %v328_v39, 4 }
  0x4a   : > { %v323_v42 = vadd.f32 %v322_v40, %v321_v38  ;;  %v330_v43 = vadd.f32 %v329_v41, %v328_v39 }
  0x4c   : > { %v324_v45 = vrot.slane %v323_v42, 2  ;;  %v331_v47 = vrot.slane %v330_v43, 2 }
  0x4e   : > { %v357_v44 = vld.sshfl [vmem:[#allocation1] sm:$0xff pattern:$0x75316420]  ;;  %v358_v46 = vld.sshfl [vmem:[#allocation1 + $0x8] sm:$0xff pattern:$0x75316420]  ;;  %v325_v50 = vadd.f32 %v324_v45, %v323_v42  ;;  %v332_v51 = vadd.f32 %v331_v47, %v330_v43 }
  0x4f   : > { %v361_v48 = vsel %vm292_vm1, %v357_v44, 0.0  ;;  %v368_v49 = vsel %vm292_vm1, %v358_v46, 0.0 }
  0x50   : > { %v362_v52 = vrot.slane %v361_v48, 4  ;;  %v369_v53 = vrot.slane %v368_v49, 4  ;;  %v326_v54 = vrot.slane %v325_v50, 1  ;;  %v333_v55 = vrot.slane %v332_v51, 1 }
  0x52   : > { %v363_v56 = vadd.f32 %v362_v52, %v361_v48  ;;  %v370_v57 = vadd.f32 %v369_v53, %v368_v49  ;;  %v327_v58 = vadd.f32 %v326_v54, %v325_v50  ;;  %v334_v59 = vadd.f32 %v333_v55, %v332_v51 }
  0x53   : > { %v420_v51 = vperm.slane %v606_v10, 1  ;;  %v419_v54 = vperm.slane %v606_v10, 0 }
  0x54   : > { %v364_v60 = vrot.slane %v363_v56, 2  ;;  %v371_v61 = vrot.slane %v370_v57, 2  ;;  %674 = vlog2.f32 %v327_v58  ;;  %v417_v58 = vld [vmem:[#allocation2] sm:$0x3] }
  0x55   : > { %676 = vlog2.f32 %v334_v59 }
  0x56   : > { %v365_v62 = vadd.f32 %v364_v60, %v363_v56  ;;  %v372_v63 = vadd.f32 %v371_v61, %v370_v57 }
  0x58   : > { %v366_v0 = vrot.slane %v365_v62, 1  ;;  %v373_v4 = vrot.slane %v372_v63, 1 }
  0x5a   : > { %v675_v1 = vpop.eup %674  ;;  %v367_v7 = vadd.f32 %v366_v0, %v365_v62  ;;  %v374_v9 = vadd.f32 %v373_v4, %v372_v63 }
  0x5b   : > { %v677_v5 = vpop.eup %676  ;;  %v336_v6 = vmul.f32 0.6931472, %v675_v1 }
  0x5c   : > { %v338_v8 = vmul.f32 0.6931472, %v677_v5 }
  0x5d   : > { %v396_v13 = vsub.f32 %v367_v7, %v336_v6 }
  0x5e   : > { %v397_v14 = vsub.f32 %v374_v9, %v338_v8 }
  0x5f   : > { %v398_v15 = vmul.f32 1.442695, %v396_v13 }
  0x60   : > { %v400_v16 = vmul.f32 1.442695, %v397_v14 }
  0x61   : > { %678 = vpow2.f32 %v398_v15 }
  0x62   : > { %680 = vpow2.f32 %v400_v16 }
  0x67   : > { %v679_v27 = vpop.eup %678 }
  0x68   : > { %v681_v30 = vpop.eup %680 }
  0x8f   : > { %v378_v20 = vpop.permute.xlu0 %377 }
  0x90   : > { %v380_v21 = vmul.f32 %v604_v33, %v378_v20  ;;  %v381_v22 = vmul.f32 %v605_v31, %v378_v20  ;;  %v406_v33 = vsub.f32 1.0, %v679_v27  ;;  %v407_v31 = vsub.f32 1.0, %v681_v30 }
  0x92   : > { %v382_v25 = vsel %vm292_vm1, %v380_v21, 0.0  ;;  %v389_v26 = vsel %vm292_vm1, %v381_v22, 0.0  ;;  %v408_v41 = vmax.f32 %v406_v33, 0.0  ;;  %v409_v42 = vmax.f32 %v407_v31, 0.0 }
  0x93   : > { %v383_v28 = vrot.slane %v382_v25, 4  ;;  %v390_v29 = vrot.slane %v389_v26, 4 }
  0x94   : > { %v410_v47 = vmul.f32 %v408_v41, %v408_v41  ;;  %v411_v48 = vmul.f32 %v409_v42, %v409_v42 }
  0x95   : > { %v384_v32 = vadd.f32 %v383_v28, %v382_v25  ;;  %v391_v34 = vadd.f32 %v390_v29, %v389_v26 }
  0x97   : > { %v385_v35 = vrot.slane %v384_v32, 2  ;;  %v392_v36 = vrot.slane %v391_v34, 2 }
  0x99   : > { %v386_v37 = vadd.f32 %v385_v35, %v384_v32  ;;  %v393_v38 = vadd.f32 %v392_v36, %v391_v34 }
  0x9b   : > { %v387_v39 = vrot.slane %v386_v37, 1  ;;  %v394_v40 = vrot.slane %v393_v38, 1 }
  0x9d   : > { %v388_v43 = vadd.f32 %v387_v39, %v386_v37  ;;  %v395_v44 = vadd.f32 %v394_v40, %v393_v38 }
  0x9f   : > { %v402_v45 = vsub.f32 0.0, %v388_v43  ;;  %v403_v46 = vsub.f32 0.0, %v395_v44 }
  0xa1   : > { %v404_v49 = vmul.f32 %v402_v45, %v396_v13  ;;  %v405_v50 = vmul.f32 %v403_v46, %v397_v14 }
  0xa3   : > { %v412_v52 = vmul.f32 %v410_v47, %v404_v49  ;;  %v413_v53 = vmul.f32 %v411_v48, %v405_v50 }
  0xa5   : > { %v424_v55 = vmul.f32 %v420_v51, %v413_v53  ;;  %v423_v56 = vmul.f32 %v419_v54, %v412_v52 }
  0xa7   : > { %v427_v57 = vrot.slane %v424_v55, 7 }
  0xa9   : > { %v429_v59 = vsel %vm428_vm5, %v423_v56, %v427_v57 }
  0xaa   : > { %v431_v60 = vadd.f32 %v429_v59, %v417_v58 }
  0xac   : > { %436 = vst.msk [vmem:[#allocation2] sm:$0x3] %vm856_vm0, %v431_v60 }
  0xad   : > { %v474_v5 = vpop.xlane.xlu1 %473 }
  0xae   : > { %v475_v6 = vrot.slane %v474_v5, 4 }
  0xb0   : > { %v476_v7 = vadd.f32 %v475_v6, %v474_v5 }
  0xb2   : > { %v477_v8 = vrot.slane %v476_v7, 2 }
  0xb3   : > { %v443_v61 = vld [vmem:[#allocation2] sm:$0x3] }
  0xb4   : > { %v445_v62 = vperm.slane %v443_v61, 0  ;;  %v446_v63 = vperm.slane %v443_v61, 1  ;;  %v478_v2 = vadd.f32 %v477_v8, %v476_v7 }
  0xb6   : > { %v449_v0 = vsel %vm428_vm5, %v445_v62, 0.0  ;;  %v450_v1 = vsel %vm428_vm5, %v446_v63, 0.0  ;;  %v479_v14 = vrot.slane %v478_v2, 1 }
  0xb7   : > { %v451_v4 = vadd.f32 %v450_v1, %v449_v0 }
  0xb8   : > { %v480_v17 = vadd.f32 %v479_v14, %v478_v2 }
  0xb9   : > { %452 = vadd.xlane.f32.xlu0 %v451_v4 }
 0x12c   : > { %v453_v9 = vpop.xlane.xlu0 %452 }
 0x12d   : > { %v454_v10 = vrot.slane %v453_v9, 4 }
 0x12f   : > { %v455_v11 = vadd.f32 %v454_v10, %v453_v9 }
 0x131   : > { %v456_v12 = vrot.slane %v455_v11, 2 }
 0x133   : > { %v457_v13 = vadd.f32 %v456_v12, %v455_v11 }
 0x135   : > { %v458_v15 = vrot.slane %v457_v13, 1 }
 0x137   : > { %v459_v16 = vadd.f32 %v458_v15, %v457_v13 }
 0x139   : > { %610 = vpush %v459_v16 }
 0x13a   : > { %612 = vpush %v480_v17 }
 0x16a   : > { %s611_s6 = spop %610 }
 0x16b   : > { %v461_v18 = vstv %s611_s6  ;;  %s613_s10 = spop %612 }
 0x16c   : > { %463 = vst.msk [vmem:[%s269_s5] sm:$0x1] %vm462_vm6, %v461_v18  ;;  %v482_v19 = vstv %s613_s10 }
 0x16d   : > { %483 = vst.msk [vmem:[%s272_s9] sm:$0x1] %vm462_vm6, %v482_v19 }
 0x16e PF: > { %s18_s20 = sadd.s32 1, %s762_s20   ;;  %s934_s15 = smov %s746_s16 }
 0x16f   : > { %p15_p0 = scmp.ge.s32.totalorder %s18_s20, 4   ;;  %s935_s16 = smov %s750_s17 }
 0x170   : > { %s936_s17 = smov %s840_s27  ;;  %s937_s18 = smov %s758_s19 }
 0x171   : > { %s938_s19 = smov %s940_s22  ;;  %17 = sbr.rel (!%p15_p0) target bundleno = 4 (0x4), region = 95 }
 0x176   :  { %513 = vsyncpa [#allocation5], 1 }
 0x177   :  { %515 = vsyncpa [#allocation5 + $0x1], 1 }

</bundles_post_ra>
